<compile_context>
chip_gen: v7x
topology: tpu7x:2x2x1
jax: 0.10.0
libtpu: 0.0.40
codegen_flags: <defaults>
</compile_context>

<pallas_src>
import functools

import jax
import jax.numpy as jnp
from jax.experimental import pallas as pl
from jax.experimental.pallas import tpu as pltpu


# ---------------------------------------------------------------------------
# Kernels
# ---------------------------------------------------------------------------
def _lct_fused_kernel(x_ref, w_ref, b_ref, o_ref, *, eps):
    # x block: (gt, cg, HW); w/b blocks: (gt, cg, 1). All group statistics are
    # computed within a leading index (no cross-group mixing), so partial tiles
    # along the leading axis are safe (garbage rows are never stored).
    x = x_ref[...].astype(jnp.float32)                        # (gt, cg, HW)
    row_mean = jnp.mean(x, axis=-1, keepdims=True)            # (gt, cg, 1)  lane reduce
    g_mean = jnp.mean(row_mean, axis=1, keepdims=True)        # (gt, 1, 1)   sublane reduce
    g_mean2 = jnp.mean(row_mean * row_mean, axis=1, keepdims=True)
    var = jnp.maximum(g_mean2 - g_mean * g_mean, 0.0)
    y_norm = (row_mean - g_mean) * jax.lax.rsqrt(var + eps)   # (gt, cg, 1)
    z = w_ref[...] * y_norm + b_ref[...]
    gate = 1.0 / (1.0 + jnp.exp(-z))                          # (gt, cg, 1)
    o_ref[...] = (x * gate).astype(o_ref.dtype)               # broadcast over lanes


def _pool_kernel(x_ref, s_ref, *, hw, ct):
    # Accumulate per-row spatial sums over HW chunks (resident (rt,1) output block).
    j = pl.program_id(1)

    @pl.when(j == 0)
    def _():
        s_ref[...] = jnp.zeros_like(s_ref)

    x = x_ref[...].astype(jnp.float32)
    lane = jax.lax.broadcasted_iota(jnp.int32, x.shape, 1) + j * ct
    x = jnp.where(lane < hw, x, 0.0)                          # mask partial HW chunk
    s_ref[...] += jnp.sum(x, axis=-1, keepdims=True)


def _scale_kernel(x_ref, g_ref, o_ref):
    # Multiply in f32, cast once to the output dtype.
    o_ref[...] = (x_ref[...].astype(jnp.float32) * g_ref[...]).astype(o_ref.dtype)


# ---------------------------------------------------------------------------
# Tiling helpers
# ---------------------------------------------------------------------------
def _round_up(x, m):
    return (x + m - 1) // m * m


def _vmem_capacity_bytes():
    try:
        info = pltpu.get_tpu_info()
        cap = getattr(info, "vmem_capacity_bytes", None)
        if cap:
            return int(cap)
    except Exception:
        pass
    return 64 << 20  # conservative (v7x-class)


# ---------------------------------------------------------------------------
# Forward
# ---------------------------------------------------------------------------
@functools.partial(jax.jit,
                   static_argnames=("groups", "eps", "force_unfused", "block_bytes"))
def lct_forward(x, w, b, *, groups, eps=1e-05, force_unfused=False, block_bytes=None):
    B, C, H, W = x.shape
    assert C % groups == 0, "channels must be divisible by groups"
    cg = C // groups
    BG = B * groups
    HW = H * W
    itemsize = jnp.dtype(x.dtype).itemsize
    sub = {4: 8, 2: 16, 1: 32}.get(int(itemsize), 8)

    # Generation-aware block/VMEM budget.
    cap = _vmem_capacity_bytes()
    if cap <= (64 << 20):            # v7x-class: 64 MiB VMEM per TensorCore
        target = 8 << 20
        limit_cap = 52 << 20
    else:                            # v5e / v6e: 128 MiB VMEM
        target = 16 << 20
        limit_cap = 100 << 20
    if block_bytes is not None:
        target = int(block_bytes)
    headroom = 6 << 20

    cg_pad = _round_up(cg, sub)      # sublane padding of the channel dim
    hw_pad = _round_up(HW, 128)      # lane padding of the spatial dim

    # Fused per-group-row VMEM footprint: x in/out double-buffered, f32 compute
    # temporaries, plus the lane-padded (gt, cg, 1) w/b blocks (double-buffered).
    per_group = (4 * cg_pad * hw_pad * itemsize
                 + 3 * cg_pad * hw_pad * 4
                 + 4 * cg_pad * 128 * 4)
    fused_ok = (not force_unfused) and (per_group + headroom <= limit_cap)

    if fused_ok:
        # ---------------- fused single pass: 1 read + 1 write of x ----------------
        gt = max(1, min(target // max(1, cg_pad * hw_pad * itemsize),
                        (limit_cap - headroom) // per_group))
        gt = min(gt, BG)
        nb = pl.cdiv(BG, gt)
        if nb > 1 and nb % 2 == 1:   # even step count so both v7x TensorCores get whole tiles
            gt = pl.cdiv(BG, nb + 1)
            nb = pl.cdiv(BG, gt)
        vmem_limit = int(min(limit_cap, max(32 << 20, gt * per_group + headroom)))

        x3 = x.reshape(BG, cg, HW)
        w3 = jnp.broadcast_to(w.astype(jnp.float32).reshape(1, groups, cg),
                              (B, groups, cg)).reshape(BG, cg, 1)
        b3 = jnp.broadcast_to(b.astype(jnp.float32).reshape(1, groups, cg),
                              (B, groups, cg)).reshape(BG, cg, 1)

        out3 = pl.pallas_call(
            functools.partial(_lct_fused_kernel, eps=eps),
            out_shape=jax.ShapeDtypeStruct((BG, cg, HW), x.dtype),
            grid=(nb,),
            in_specs=[pl.BlockSpec((gt, cg, HW), lambda i: (i, 0, 0)),
                      pl.BlockSpec((gt, cg, 1), lambda i: (i, 0, 0)),
                      pl.BlockSpec((gt, cg, 1), lambda i: (i, 0, 0))],
            out_specs=pl.BlockSpec((gt, cg, HW), lambda i: (i, 0, 0)),
            compiler_params=pltpu.CompilerParams(
                dimension_semantics=("parallel",),
                vmem_limit_bytes=vmem_limit),
        )(x3, w3, b3)
        return out3.reshape(B, C, H, W)

    # ---------------- fallback: tiled pool + XLA gate + tiled scale ----------------
    R = B * C
    x2 = x.reshape(R, HW)

    if HW * itemsize * sub > target and HW > 128:
        # huge spatial maps: chunk the lane axis
        rt = R if R <= sub else sub
        ct = min((HW // 128) * 128,
                 max(128, (target // max(1, rt * itemsize)) // 128 * 128))
    else:
        ct = HW
        if R <= sub:
            rt = R
        else:
            rt = min((R // sub) * sub,
                     max(sub, (target // max(1, HW * itemsize)) // sub * sub))

    nrb = pl.cdiv(R, rt)
    ncb = pl.cdiv(HW, ct)
    blk = _round_up(rt, sub) * _round_up(ct, 128)
    vmem_io = int(min(limit_cap,
                      max(32 << 20, blk * (4 * itemsize + 3 * 4) + (4 << 20))))

    # 1) global average pool (sum over HW chunks, resident accumulator per row block)
    pooled = pl.pallas_call(
        functools.partial(_pool_kernel, hw=HW, ct=ct),
        out_shape=jax.ShapeDtypeStruct((R, 1), jnp.float32),
        grid=(nrb, ncb),
        in_specs=[pl.BlockSpec((rt, ct), lambda i, j: (i, j))],
        out_specs=pl.BlockSpec((rt, 1), lambda i, j: (i, 0)),
        compiler_params=pltpu.CompilerParams(
            dimension_semantics=("parallel", "arbitrary"),
            vmem_limit_bytes=vmem_io),
    )(x2)
    pooled = pooled * (1.0 / HW)

    # 2) tiny group-norm + affine + sigmoid: plain XLA (no dedicated pallas_call)
    y = pooled.reshape(B, groups, cg)
    mean = jnp.mean(y, axis=-1, keepdims=True)
    mean2 = jnp.mean(y * y, axis=-1, keepdims=True)
    var = jnp.maximum(mean2 - mean * mean, 0.0)
    y_norm = (y - mean) * jax.lax.rsqrt(var + eps)
    z = (w.astype(jnp.float32).reshape(1, groups, cg) * y_norm
         + b.astype(jnp.float32).reshape(1, groups, cg))
    gate = (1.0 / (1.0 + jnp.exp(-z))).reshape(R, 1)

    # 3) scale x by the per-(batch, channel) gate
    out2 = pl.pallas_call(
        _scale_kernel,
        out_shape=jax.ShapeDtypeStruct((R, HW), x.dtype),
        grid=(nrb, ncb),
        in_specs=[pl.BlockSpec((rt, ct), lambda i, j: (i, j)),
                  pl.BlockSpec((rt, 1), lambda i, j: (i, 0))],
        out_specs=pl.BlockSpec((rt, ct), lambda i, j: (i, j)),
        compiler_params=pltpu.CompilerParams(
            dimension_semantics=("parallel", "parallel"),
            vmem_limit_bytes=vmem_io),
    )(x2, gate)
    return out2.reshape(B, C, H, W)


# ---------------------------------------------------------------------------
# Test
# ---------------------------------------------------------------------------
def _lct_ref(x, w, b, groups, eps):
    # Pure-JAX replica of the torch LCT forward.
    Bb, Cc, Hh, Ww = x.shape
    y = jnp.mean(x, axis=(2, 3)).reshape(Bb, groups, -1)
    mean = jnp.mean(y, axis=-1, keepdims=True)
    mean_x2 = jnp.mean(y * y, axis=-1, keepdims=True)
    var = mean_x2 - mean * mean
    y_norm = (y - mean) / jnp.sqrt(var + eps)
    y_norm = y_norm.reshape(Bb, Cc, 1, 1)
    y_norm = w.reshape(1, -1, 1, 1) * y_norm + b.reshape(1, -1, 1, 1)
    gate = jax.nn.sigmoid(y_norm)
    return x * gate


if __name__ == "__main__":
    key = jax.random.PRNGKey(0)
    eps = 1e-05
    atol = 1e-4

    # Case 1: fused single-pass kernel (default path).
    k1, k2, k3 = jax.random.split(key, 3)
    B, C, H, W, G = 2, 4, 16, 16, 2
    x = jax.random.normal(k1, (B, C, H, W), dtype=jnp.float32) * 2.0
    w = 1.0 + 0.1 * jax.random.normal(k2, (C,), dtype=jnp.float32)
    b = 0.1 * jax.random.normal(k3, (C,), dtype=jnp.float32)

    y1 = lct_forward(x, w, b, groups=G, eps=eps)
    jax.block_until_ready(y1)
    r1 = _lct_ref(x, w, b, G, eps)
    assert y1.shape == x.shape and y1.dtype == x.dtype
    e1 = float(jnp.max(jnp.abs(y1 - r1)))
    assert e1 < atol, f"fused path max abs err {e1}"

    # Case 2: fallback path (pool + XLA gate + scale), tiny blocks to force HW chunking.
    y2 = lct_forward(x, w, b, groups=G, eps=eps, force_unfused=True, block_bytes=4096)
    jax.block_until_ready(y2)
    e2 = float(jnp.max(jnp.abs(y2 - r1)))
    assert e2 < atol, f"fallback path max abs err {e2}"

    # Case 3: fused path with multiple grid steps, a partial last block and odd HW.
    k4, k5, k6 = jax.random.split(jax.random.PRNGKey(0), 3)
    B3, C3, H3, W3, G3 = 2, 20, 10, 10, 5
    x3 = jax.random.normal(k4, (B3, C3, H3, W3), dtype=jnp.float32)
    w3 = 1.0 + 0.1 * jax.random.normal(k5, (C3,), dtype=jnp.float32)
    b3 = 0.1 * jax.random.normal(k6, (C3,), dtype=jnp.float32)
    y3 = lct_forward(x3, w3, b3, groups=G3, eps=eps, block_bytes=12288)
    jax.block_until_ready(y3)
    r3 = _lct_ref(x3, w3, b3, G3, eps)
    e3 = float(jnp.max(jnp.abs(y3 - r3)))
    assert e3 < atol, f"fused multi-step path max abs err {e3}"

    print("KERNEL_OK")
</pallas_src>

<mosaic_0001>
module attributes {stable_mosaic.version = 11 : i64} {
  func.func @_lct_fused_kernel(%arg0: i32, %arg1: memref<4x2x256xf32, #tpu.memory_space<vmem>>, %arg2: memref<4x2x1xf32, #tpu.memory_space<vmem>>, %arg3: memref<4x2x1xf32, #tpu.memory_space<vmem>>, %arg4: memref<4x2x256xf32, #tpu.memory_space<vmem>>) attributes {dimension_semantics = [#tpu.dimension_semantics<parallel>], iteration_bounds = array<i64: 1>, scalar_prefetch = 0 : i64, scratch_operands = 0 : i64, tpu.core_type = #tpu.core_type<tc>, window_params = [{transform_indices = @transform_0, window_bounds = array<i64: 4, 2, 256>}, {transform_indices = @transform_1, window_bounds = array<i64: 4, 2, 1>}, {transform_indices = @transform_2, window_bounds = array<i64: 4, 2, 1>}, {transform_indices = @transform_3, window_bounds = array<i64: 4, 2, 256>}]} {
    %c0 = arith.constant 0 : index
    %c0_0 = arith.constant 0 : index
    %c0_1 = arith.constant 0 : index
    %0 = vector.load %arg1[%c0, %c0_0, %c0_1] : memref<4x2x256xf32, #tpu.memory_space<vmem>>, vector<4x2x256xf32>
    %cst = arith.constant dense<0.000000e+00> : vector<4x2xf32>
    %1 = vector.multi_reduction <add>, %0, %cst [2] : vector<4x2x256xf32> to vector<4x2xf32>
    %2 = vector.shape_cast %1 : vector<4x2xf32> to vector<4x2x1xf32>
    %cst_2 = arith.constant 2.560000e+02 : f32
    %3 = vector.broadcast %cst_2 : f32 to vector<4x2x1xf32>
    %4 = arith.divf %2, %3 : vector<4x2x1xf32>
    %cst_3 = arith.constant dense<0.000000e+00> : vector<4x1xf32>
    %5 = vector.multi_reduction <add>, %4, %cst_3 [1] : vector<4x2x1xf32> to vector<4x1xf32>
    %6 = vector.shape_cast %5 : vector<4x1xf32> to vector<4x1x1xf32>
    %cst_4 = arith.constant 2.000000e+00 : f32
    %7 = vector.broadcast %cst_4 : f32 to vector<4x1x1xf32>
    %8 = arith.divf %6, %7 : vector<4x1x1xf32>
    %9 = arith.mulf %4, %4 : vector<4x2x1xf32>
    %cst_5 = arith.constant dense<0.000000e+00> : vector<4x1xf32>
    %10 = vector.multi_reduction <add>, %9, %cst_5 [1] : vector<4x2x1xf32> to vector<4x1xf32>
    %11 = vector.shape_cast %10 : vector<4x1xf32> to vector<4x1x1xf32>
    %cst_6 = arith.constant 2.000000e+00 : f32
    %12 = vector.broadcast %cst_6 : f32 to vector<4x1x1xf32>
    %13 = arith.divf %11, %12 : vector<4x1x1xf32>
    %14 = arith.mulf %8, %8 : vector<4x1x1xf32>
    %15 = arith.subf %13, %14 : vector<4x1x1xf32>
    %cst_7 = arith.constant 0.000000e+00 : f32
    %16 = vector.broadcast %cst_7 : f32 to vector<4x1x1xf32>
    %17 = arith.maximumf %15, %16 : vector<4x1x1xf32>
    %18 = vector.broadcast %8 : vector<4x1x1xf32> to vector<4x2x1xf32>
    %19 = arith.subf %4, %18 : vector<4x2x1xf32>
    %cst_8 = arith.constant 9.99999974E-6 : f32
    %20 = vector.broadcast %cst_8 : f32 to vector<4x1x1xf32>
    %21 = arith.addf %17, %20 : vector<4x1x1xf32>
    %22 = math.rsqrt %21 : vector<4x1x1xf32>
    %23 = vector.broadcast %22 : vector<4x1x1xf32> to vector<4x2x1xf32>
    %24 = arith.mulf %19, %23 : vector<4x2x1xf32>
    %c0_9 = arith.constant 0 : index
    %c0_10 = arith.constant 0 : index
    %c0_11 = arith.constant 0 : index
    %25 = vector.load %arg2[%c0_9, %c0_10, %c0_11] : memref<4x2x1xf32, #tpu.memory_space<vmem>>, vector<4x2x1xf32>
    %26 = arith.mulf %25, %24 : vector<4x2x1xf32>
    %c0_12 = arith.constant 0 : index
    %c0_13 = arith.constant 0 : index
    %c0_14 = arith.constant 0 : index
    %27 = vector.load %arg3[%c0_12, %c0_13, %c0_14] : memref<4x2x1xf32, #tpu.memory_space<vmem>>, vector<4x2x1xf32>
    %28 = arith.addf %26, %27 : vector<4x2x1xf32>
    %cst_15 = arith.constant 0.000000e+00 : f32
    %29 = vector.broadcast %cst_15 : f32 to vector<4x2x1xf32>
    %30 = arith.subf %29, %28 : vector<4x2x1xf32>
    %31 = math.exp %30 : vector<4x2x1xf32>
    %cst_16 = arith.constant 1.000000e+00 : f32
    %32 = vector.broadcast %cst_16 : f32 to vector<4x2x1xf32>
    %33 = arith.addf %32, %31 : vector<4x2x1xf32>
    %cst_17 = arith.constant 1.000000e+00 : f32
    %34 = vector.broadcast %cst_17 : f32 to vector<4x2x1xf32>
    %35 = arith.divf %34, %33 : vector<4x2x1xf32>
    %36 = vector.broadcast %35 : vector<4x2x1xf32> to vector<4x2x256xf32>
    %37 = arith.mulf %0, %36 : vector<4x2x256xf32>
    %c0_18 = arith.constant 0 : index
    %c0_19 = arith.constant 0 : index
    %c0_20 = arith.constant 0 : index
    %38 = vector.load %arg4[%c0_18, %c0_19, %c0_20] : memref<4x2x256xf32, #tpu.memory_space<vmem>>, vector<4x2x256xf32>
    tpu.vector_store %arg4[%c0_18, %c0_19, %c0_20], %37 {strides = array<i32>} : memref<4x2x256xf32, #tpu.memory_space<vmem>>, vector<4x2x256xf32>,
    return
  }
  func.func @transform_0(%arg0: i32) -> (i32, i32, i32) {
    %c0_i32 = arith.constant 0 : i32
    %c0_i32_0 = arith.constant 0 : i32
    %c0_i32_1 = arith.constant 0 : i32
    return %arg0, %c0_i32, %c0_i32_0 : i32, i32, i32
  }
  func.func @transform_1(%arg0: i32) -> (i32, i32, i32) {
    %c0_i32 = arith.constant 0 : i32
    %c0_i32_0 = arith.constant 0 : i32
    %c0_i32_1 = arith.constant 0 : i32
    return %arg0, %c0_i32, %c0_i32_0 : i32, i32, i32
  }
  func.func @transform_2(%arg0: i32) -> (i32, i32, i32) {
    %c0_i32 = arith.constant 0 : i32
    %c0_i32_0 = arith.constant 0 : i32
    %c0_i32_1 = arith.constant 0 : i32
    return %arg0, %c0_i32, %c0_i32_0 : i32, i32, i32
  }
  func.func @transform_3(%arg0: i32) -> (i32, i32, i32) {
    %c0_i32 = arith.constant 0 : i32
    %c0_i32_0 = arith.constant 0 : i32
    %c0_i32_1 = arith.constant 0 : i32
    return %arg0, %c0_i32, %c0_i32_0 : i32, i32, i32
  }
}

</mosaic_0001>

<bundles_post_ra>
// kernel: lct_forward.1
= control target key start
LH: loop header
LB: loop body
LE: loop exit
PB: predicated region body
PF: predicated region fallthrough
CT: control target
= control target key end

     0   :  { %v25_v0 = vlaneseq  ;;  %v314_v1 = vmov 1983009808   ;;  %vm62_vm0 = vcmask 1041408   ;;  %v315_v30 = vmov 0   ;;  %s445_s0 = inlined_call_operand.vmem [shape: f32[4,2,256], index: 0, kind: input, shape index: {}]   ;;  %s446_s1 = inlined_call_operand.vmem [shape: f32[4,2,1], index: 1, kind: input, shape index: {}]   ;;  %s447_s2 = inlined_call_operand.vmem [shape: f32[4,2,1], index: 2, kind: input, shape index: {}]   ;;  %s448_s3 = inlined_call_operand.vmem [shape: f32[4,2,256], index: 3, kind: output, shape index: {}]  }
   0x1   :  { %v23_v2 = vunpack.c.l.s4 %v314_v1  ;;  %v342_v4 = vld [vmem:[%s445_s0 + $0x8] sm:$0xf]  ;;  %v347_v6 = vld [vmem:[%s445_s0] sm:$0xf]  ;;  %v352_v7 = vld [vmem:[%s445_s0 + $0xc] sm:$0xf]  ;;  %288 = vset.pattern.permute.xlu0 %v315_v30  ;;  %289 = vset.pattern.permute.xlu1 %v315_v30 }
   0x2   :  { %v337_v3 = vshrl.u32 %v25_v0, 7  ;;  %v357_v8 = vld [vmem:[%s445_s0 + $0x4] sm:$0xf] }
   0x3   :  { %v24_v5 = vunpack.c.0.s8 %v23_v2 }
   0x5   :  { %v27_v9 = vsub.s32 %v24_v5, %v337_v3 }
   0x7   :  { %v44_v10 = vrot.slane %v342_v4, %v27_v9  ;;  %v28_v11 = vrot.slane %v347_v6, %v27_v9  ;;  %v52_v12 = vrot.slane %v352_v7, %v27_v9  ;;  %v36_v13 = vrot.slane %v357_v8, %v27_v9 }
   0x9   :  { %v45_v14 = vcombine.high %v44_v10, %v44_v10  ;;  %v73_v15 = vsel %vm62_vm0, %v44_v10, 0.0  ;;  %v29_v16 = vcombine.high %v28_v11, %v28_v11  ;;  %v63_v17 = vsel %vm62_vm0, %v28_v11, 0.0 }
   0xa   :  { %v53_v18 = vcombine.high %v52_v12, %v52_v12  ;;  %v37_v19 = vcombine.high %v36_v13, %v36_v13  ;;  %v78_v22 = vsel %vm62_vm0, %v52_v12, 0.0  ;;  %v68_v23 = vsel %vm62_vm0, %v36_v13, 0.0 }
   0xb   :  { %v74_v20 = vsel %vm62_vm0, %v45_v14, 0.0  ;;  %v64_v21 = vsel %vm62_vm0, %v29_v16, 0.0 }
   0xc   :  { %v75_v24 = vadd.f32 %v74_v20, %v73_v15  ;;  %v65_v25 = vadd.f32 %v64_v21, %v63_v17  ;;  %v79_v26 = vsel %vm62_vm0, %v53_v18, 0.0  ;;  %v69_v27 = vsel %vm62_vm0, %v37_v19, 0.0 }
   0xd   :  { %v80_v28 = vadd.f32 %v79_v26, %v78_v22  ;;  %v70_v29 = vadd.f32 %v69_v27, %v68_v23 }
   0xe   :  { %76 = vadd.xlane.f32.xlu1 %v75_v24  ;;  %66 = vadd.xlane.f32.xlu0 %v65_v25 }
  0x12   :  { %81 = vadd.xlane.f32.xlu1 %v80_v28  ;;  %71 = vadd.xlane.f32.xlu0 %v70_v29 }
  0x9b   :  { %v77_v31 = vpop.xlane.xlu1 %76  ;;  %v67_v32 = vpop.xlane.xlu0 %66 }
  0x9c   :  { %v372_v33 = vmul.f32 0.00390625, %v77_v31  ;;  %v374_v34 = vmul.f32 0.00390625, %v67_v32 }
  0x9e   :  { %v102_v35 = vsel %vm62_vm0, %v372_v33, 0.0  ;;  %v123_v36 = vmul.f32 %v372_v33, %v372_v33  ;;  %v88_v37 = vsel %vm62_vm0, %v374_v34, 0.0  ;;  %v121_v38 = vmul.f32 %v374_v34, %v374_v34 }
  0x9f   :  { %v103_v39 = vrot.slane %v102_v35, 4  ;;  %v89_v40 = vrot.slane %v88_v37, 4  ;;  %v82_v41 = vpop.xlane.xlu1 %81  ;;  %v72_v42 = vpop.xlane.xlu0 %71 }
  0xa0   :  { %v139_v43 = vsel %vm62_vm0, %v123_v36, 0.0  ;;  %v125_v44 = vsel %vm62_vm0, %v121_v38, 0.0  ;;  %v386_v45 = vmul.f32 0.00390625, %v82_v41  ;;  %v388_v46 = vmul.f32 0.00390625, %v72_v42 }
  0xa1   :  { %v104_v47 = vadd.f32 %v103_v39, %v102_v35  ;;  %v140_v48 = vrot.slane %v139_v43, 4  ;;  %v90_v49 = vadd.f32 %v89_v40, %v88_v37  ;;  %v126_v50 = vrot.slane %v125_v44, 4 }
  0xa2   :  { %v109_v51 = vsel %vm62_vm0, %v386_v45, 0.0  ;;  %v124_v52 = vmul.f32 %v386_v45, %v386_v45  ;;  %v95_v53 = vsel %vm62_vm0, %v388_v46, 0.0  ;;  %v122_v54 = vmul.f32 %v388_v46, %v388_v46 }
  0xa3   :  { %v105_v55 = vrot.slane %v104_v47, 2  ;;  %v141_v56 = vadd.f32 %v140_v48, %v139_v43  ;;  %v91_v57 = vrot.slane %v90_v49, 2  ;;  %v127_v58 = vadd.f32 %v126_v50, %v125_v44 }
  0xa4   :  { %v110_v59 = vrot.slane %v109_v51, 4  ;;  %v146_v60 = vsel %vm62_vm0, %v124_v52, 0.0  ;;  %v96_v61 = vrot.slane %v95_v53, 4  ;;  %v132_v62 = vsel %vm62_vm0, %v122_v54, 0.0 }
  0xa5   :  { %v106_v63 = vadd.f32 %v105_v55, %v104_v47  ;;  %v142_v0 = vrot.slane %v141_v56, 2  ;;  %v92_v1 = vadd.f32 %v91_v57, %v90_v49  ;;  %v128_v2 = vrot.slane %v127_v58, 2 }
  0xa6   :  { %v111_v5 = vadd.f32 %v110_v59, %v109_v51  ;;  %v147_v9 = vrot.slane %v146_v60, 4  ;;  %v97_v10 = vadd.f32 %v96_v61, %v95_v53  ;;  %v133_v11 = vrot.slane %v132_v62, 4 }
  0xa7   :  { %v107_v12 = vrot.slane %v106_v63, 1  ;;  %v143_v13 = vadd.f32 %v142_v0, %v141_v56  ;;  %v93_v14 = vrot.slane %v92_v1, 1  ;;  %v129_v15 = vadd.f32 %v128_v2, %v127_v58 }
  0xa8   :  { %v112_v16 = vrot.slane %v111_v5, 2  ;;  %v148_v17 = vadd.f32 %v147_v9, %v146_v60  ;;  %v98_v18 = vrot.slane %v97_v10, 2  ;;  %v134_v19 = vadd.f32 %v133_v11, %v132_v62  ;;  %v187_v11 = vld [vmem:[%s446_s1 + $0x4] sm:$0x3] }
  0xa9   :  { %v108_v20 = vadd.f32 %v107_v12, %v106_v63  ;;  %v144_v21 = vrot.slane %v143_v13, 1  ;;  %v94_v22 = vadd.f32 %v93_v14, %v92_v1  ;;  %v130_v23 = vrot.slane %v129_v15, 1 }
  0xaa   :  { %v113_v24 = vadd.f32 %v112_v16, %v111_v5  ;;  %v149_v25 = vrot.slane %v148_v17, 2  ;;  %v99_v26 = vadd.f32 %v98_v18, %v97_v10  ;;  %v135_v27 = vrot.slane %v134_v19, 2  ;;  %v195_v16 = vld [vmem:[%s447_s2 + $0x4] sm:$0x3] }
  0xab   :  { %v119_v28 = vmul.f32 0.5, %v108_v20  ;;  %v145_v29 = vadd.f32 %v144_v21, %v143_v13  ;;  %v117_v30 = vmul.f32 0.5, %v94_v22  ;;  %v131_v31 = vadd.f32 %v130_v23, %v129_v15  ;;  %v185_v15 = vld [vmem:[%s446_s1] sm:$0x3]  ;;  %v188_v22 = vld [vmem:[%s446_s1 + $0x6] sm:$0x3] }
  0xac   :  { %v114_v32 = vrot.slane %v113_v24, 1  ;;  %v150_v35 = vadd.f32 %v149_v25, %v148_v17  ;;  %v100_v36 = vrot.slane %v99_v26, 1  ;;  %v136_v37 = vadd.f32 %v135_v27, %v134_v19  ;;  %v186_v27 = vld [vmem:[%s446_s1 + $0x2] sm:$0x3] }
  0xad   :  { %v155_v38 = vmul.f32 0.5, %v145_v29  ;;  %v159_v39 = vmul.f32 %v119_v28, %v119_v28  ;;  %v153_v40 = vmul.f32 0.5, %v131_v31  ;;  %v157_v41 = vmul.f32 %v117_v30, %v117_v30 }
  0xae   :  { %v115_v42 = vadd.f32 %v114_v32, %v113_v24  ;;  %v151_v43 = vrot.slane %v150_v35, 1  ;;  %v101_v47 = vadd.f32 %v100_v36, %v99_v26  ;;  %v137_v48 = vrot.slane %v136_v37, 1  ;;  %v194_v32 = vld [vmem:[%s447_s2 + $0x2] sm:$0x3] }
  0xaf   :  { %v163_v44 = vsub.f32 %v155_v38, %v159_v39  ;;  %v161_v49 = vsub.f32 %v153_v40, %v157_v41  ;;  %v171_v9 = vsub.f32 %v372_v33, %v119_v28  ;;  %v169_v12 = vsub.f32 %v374_v34, %v117_v30  ;;  %v193_v33 = vld [vmem:[%s447_s2] sm:$0x3]  ;;  %v196_v28 = vld [vmem:[%s447_s2 + $0x6] sm:$0x3] }
  0xb0   :  { %v120_v50 = vmul.f32 0.5, %v115_v42  ;;  %v152_v51 = vadd.f32 %v151_v43, %v150_v35  ;;  %v118_v53 = vmul.f32 0.5, %v101_v47  ;;  %v138_v54 = vadd.f32 %v137_v48, %v136_v37 }
  0xb1   :  { %v167_v52 = vmax.f32 %v163_v44, 0.0  ;;  %v165_v55 = vmax.f32 %v161_v49, 0.0 }
  0xb2   :  { %v156_v56 = vmul.f32 0.5, %v152_v51  ;;  %v160_v57 = vmul.f32 %v120_v50, %v120_v50  ;;  %v154_v59 = vmul.f32 0.5, %v138_v54  ;;  %v158_v60 = vmul.f32 %v118_v53, %v118_v53 }
  0xb3   :  { %v175_v58 = vadd.f32 1e-05, %v167_v52  ;;  %v173_v61 = vadd.f32 1e-05, %v165_v55  ;;  %v172_v20 = vsub.f32 %v386_v45, %v120_v50  ;;  %v170_v23 = vsub.f32 %v388_v46, %v118_v53 }
  0xb4   :  { %v164_v62 = vsub.f32 %v156_v56, %v160_v57  ;;  %v162_v63 = vsub.f32 %v154_v59, %v158_v60  ;;  %v316_v57 = vmov 269488144  }
  0xb5   :  { %290 = vrsqrt.f32 %v175_v58  ;;  %v242_v58 = vunpack.c.l.s4 %v316_v57 }
  0xb6   :  { %292 = vrsqrt.f32 %v173_v61  ;;  %v168_v0 = vmax.f32 %v164_v62, 0.0  ;;  %v166_v1 = vmax.f32 %v162_v63, 0.0 }
  0xb7   :  { %v243_v59 = vunpack.c.0.s8 %v242_v58 }
  0xb8   :  { %v176_v2 = vadd.f32 1e-05, %v168_v0  ;;  %v174_v5 = vadd.f32 1e-05, %v166_v1 }
  0xb9   :  { %v246_v60 = vsub.s32 %v243_v59, %v337_v3 }
  0xba   :  { %294 = vrsqrt.f32 %v176_v2 }
  0xbb   :  { %296 = vrsqrt.f32 %v174_v5 }
  0xbf   :  { %v291_v10 = vpop.eup %290 }
  0xc0   :  { %v293_v13 = vpop.eup %292  ;;  %v183_v14 = vmul.f32 %v291_v10, %v171_v9 }
  0xc1   :  { %v181_v17 = vmul.f32 %v293_v13, %v169_v12 }
  0xc2   :  { %v191_v18 = vmul.f32 %v187_v11, %v183_v14 }
  0xc3   :  { %v189_v19 = vmul.f32 %v185_v15, %v181_v17 }
  0xc4   :  { %v295_v34 = vpop.eup %294  ;;  %v199_v21 = vadd.f32 %v195_v16, %v191_v18 }
  0xc5   :  { %v297_v24 = vpop.eup %296  ;;  %v197_v25 = vadd.f32 %v193_v33, %v189_v19  ;;  %v184_v26 = vmul.f32 %v295_v34, %v172_v20 }
  0xc6   :  { %v182_v45 = vmul.f32 %v297_v24, %v170_v23  ;;  %v203_v29 = vsub.f32 0.0, %v199_v21 }
  0xc7   :  { %v201_v30 = vsub.f32 0.0, %v197_v25  ;;  %v192_v31 = vmul.f32 %v188_v22, %v184_v26 }
  0xc8   :  { %v190_v46 = vmul.f32 %v186_v27, %v182_v45  ;;  %v209_v38 = vmul.f32 1.442695, %v203_v29 }
  0xc9   :  { %v205_v35 = vmul.f32 1.442695, %v201_v30  ;;  %v200_v36 = vadd.f32 %v196_v28, %v192_v31 }
  0xca   :  { %v198_v37 = vadd.f32 %v194_v32, %v190_v46 }
  0xcb   :  { %298 = vpow2.f32 %v205_v35  ;;  %v204_v39 = vsub.f32 0.0, %v200_v36 }
  0xcc   :  { %v202_v40 = vsub.f32 0.0, %v198_v37  ;;  %300 = vpow2.f32 %v209_v38 }
  0xcd   :  { %v211_v42 = vmul.f32 1.442695, %v204_v39 }
  0xce   :  { %v207_v41 = vmul.f32 1.442695, %v202_v40 }
  0xd0   :  { %302 = vpow2.f32 %v207_v41 }
  0xd1   :  { %304 = vpow2.f32 %v211_v42 }
  0xd5   :  { %v299_v43 = vpop.eup %298 }
  0xd6   :  { %v213_v44 = vadd.f32 1.0, %v299_v43  ;;  %v301_v47 = vpop.eup %300 }
  0xd7   :  { %v215_v50 = vadd.f32 1.0, %v301_v47 }
  0xd8   :  { %306 = vrcp.f32 %v213_v44 }
  0xda   :  { %v303_v48 = vpop.eup %302 }
  0xdb   :  { %v214_v49 = vadd.f32 1.0, %v303_v48  ;;  %v305_v51 = vpop.eup %304 }
  0xdc   :  { %v216_v52 = vadd.f32 1.0, %v305_v51 }
  0xdd   :  { %308 = vrcp.f32 %v214_v49 }
  0xde   :  { %310 = vrcp.f32 %v215_v50 }
  0xdf   :  { %312 = vrcp.f32 %v216_v52 }
  0xe2   :  { %v307_v53 = vpop.eup %306 }
  0xe3   :  { %227 = vperm.xlu0 %288, %v307_v53  }
  0xe7   :  { %v309_v54 = vpop.eup %308 }
  0xe8   :  { %231 = vperm.xlu1 %289, %v309_v54   ;;  %v311_v55 = vpop.eup %310 }
  0xe9   :  { %v313_v56 = vpop.eup %312 }
  0xec   :  { %235 = vperm.xlu1 %289, %v311_v55  }
  0xf0   :  { %239 = vperm.xlu1 %289, %v313_v56  }
 0x162   :  { %v228_v61 = vpop.permute.xlu0 %227 }
 0x163   :  { %v247_v62 = vrot.slane %v228_v61, %v246_v60 }
 0x165   :  { %v273_v63 = vmul.f32 %v247_v62, %v347_v6 }
 0x167   :  { %277 = vst [vmem:[%s448_s3] sm:$0xf] %v273_v63  ;;  %v232_v0 = vpop.permute.xlu1 %231 }
 0x168   :  { %v254_v1 = vrot.slane %v232_v0, %v246_v60 }
 0x16a   :  { %v274_v2 = vmul.f32 %v254_v1, %v357_v8 }
 0x16b   :  { %v236_v5 = vpop.permute.xlu1 %235 }
 0x16c   :  { %278 = vst [vmem:[%s448_s3 + $0x4] sm:$0xf] %v274_v2  ;;  %v261_v9 = vrot.slane %v236_v5, %v246_v60 }
 0x16e   :  { %v275_v3 = vmul.f32 %v261_v9, %v342_v4 }
 0x16f   :  { %v240_v10 = vpop.permute.xlu1 %239 }
 0x170   :  { %279 = vst [vmem:[%s448_s3 + $0x8] sm:$0xf] %v275_v3  ;;  %v268_v6 = vrot.slane %v240_v10, %v246_v60 }
 0x172   :  { %v276_v11 = vmul.f32 %v268_v6, %v352_v7 }
 0x174   :  { %280 = vst [vmem:[%s448_s3 + $0xc] sm:$0xf] %v276_v11 }

</bundles_post_ra>
